<compile_context>
chip_gen: v6e
topology: v6e:2x2x1
jax: 0.10.0
libtpu: 0.0.40
codegen_flags: <defaults>
</compile_context>

<pallas_src>
import jax
import jax.numpy as jnp
from jax.experimental import pallas as pl
from jax.experimental.pallas import tpu as pltpu

_LANES = 128


def _relu_kernel(x_ref, o_ref):
    # Elementwise ReLU on the current VMEM tile (single VPU max per vreg).
    o_ref[...] = jnp.maximum(x_ref[...], jnp.zeros((), dtype=x_ref.dtype))


def _round_up(a: int, m: int) -> int:
    return ((a + m - 1) // m) * m


def _tpu_vmem_budget():
    """Returns (vmem_limit_cap_bytes, is_multi_tensorcore_chip)."""
    cap = None
    try:
        info = pltpu.get_tpu_info()
        cap = int(getattr(info, "vmem_capacity_bytes", 0)) or None
    except Exception:
        cap = None
    if cap is None:
        cap = 64 << 20  # conservative fallback: assume v7x-style 64 MiB / TC
    # Leave 16 MiB headroom for Mosaic internal scratch; never request >100 MiB.
    limit_cap = max(32 << 20, min(cap - (16 << 20), 100 << 20))
    multi_tc = cap <= (64 << 20)  # v7x heuristic: 2 TCs/chip, 64 MiB VMEM per TC
    return limit_cap, multi_tc


def _relu_2d(x2d: jax.Array, *, target_tile_bytes: int) -> jax.Array:
    """ReLU on a lane-dense (rows, 128) slab via a single pallas_call."""
    rows, lanes = x2d.shape
    assert lanes == _LANES
    dtype = x2d.dtype
    itemsize = jnp.dtype(dtype).itemsize
    sub_mult = max(8, 32 // itemsize)  # 8 (f32) / 16 (bf16) / 32 (int8)

    limit_cap, multi_tc = _tpu_vmem_budget()
    slack = 4 << 20

    # Tile rows from a byte budget (constant tile *bytes* across dtypes).
    br = max(sub_mult,
             (target_tile_bytes // (_LANES * itemsize)) // sub_mult * sub_mult)
    # Clamp so 4 double-buffered tiles (+slack) always fit the VMEM limit.
    max_tile_bytes = max(_LANES * itemsize * sub_mult, (limit_cap - slack) // 4)
    br_cap = max(sub_mult,
                 (max_tile_bytes // (_LANES * itemsize)) // sub_mult * sub_mult)
    br = min(br, br_cap)
    # Don't allocate more tile than there is data.
    br = min(br, _round_up(rows, sub_mult))

    # v7x only: ensure an even number of grid steps on large inputs so both
    # TensorCores get equal work (grid axis is marked "parallel").
    if multi_tc and rows * _LANES * itemsize >= (1 << 20):
        steps = pl.cdiv(rows, br)
        if steps % 2 == 1:
            steps = 2 if steps == 1 else steps + 1
            br = max(sub_mult, _round_up(pl.cdiv(rows, steps), sub_mult))

    tile_bytes = br * _LANES * itemsize
    vmem_limit = int(min(limit_cap, max(32 << 20, 4 * tile_bytes + slack)))

    n_bytes = rows * _LANES * itemsize
    cost = pl.CostEstimate(flops=rows * _LANES,
                           transcendentals=0,
                           bytes_accessed=2 * n_bytes)

    return pl.pallas_call(
        _relu_kernel,
        out_shape=jax.ShapeDtypeStruct((rows, _LANES), dtype),
        grid_spec=pltpu.PrefetchScalarGridSpec(
            num_scalar_prefetch=0,
            grid=(pl.cdiv(rows, br),),
            in_specs=[pl.BlockSpec((br, _LANES), lambda i: (i, 0))],
            out_specs=pl.BlockSpec((br, _LANES), lambda i: (i, 0)),
        ),
        compiler_params=pltpu.CompilerParams(
            dimension_semantics=("parallel",),
            vmem_limit_bytes=vmem_limit,
        ),
        cost_estimate=cost,
    )(x2d)


def relu_pallas(x: jax.Array, *, target_tile_bytes: int = 8 << 20) -> jax.Array:
    """ReLU via a Pallas TPU kernel; works for any shape/dtype.

    Fast path (x.size % 128 == 0): zero padding, zero slicing -- one HBM
    read + one write at roofline.  Ragged sizes: 128-aligned bulk through the
    kernel, <128-element tail via a tiny jnp.maximum (no full-array pad/slice
    passes).
    """
    orig_shape = x.shape
    n = x.size
    if n == 0:
        return x

    rem = n % _LANES
    if rem == 0:
        out2d = _relu_2d(x.reshape(-1, _LANES),
                         target_tile_bytes=target_tile_bytes)
        return out2d.reshape(orig_shape)

    # Ragged path: pad-free.
    x_flat = x.reshape(-1)
    bulk_n = n - rem
    zero = jnp.zeros((), dtype=x.dtype)
    tail_out = jnp.maximum(x_flat[bulk_n:], zero)  # <128 elements, negligible
    if bulk_n == 0:
        return tail_out.reshape(orig_shape)
    bulk_out = _relu_2d(x_flat[:bulk_n].reshape(-1, _LANES),
                        target_tile_bytes=target_tile_bytes)
    return jnp.concatenate([bulk_out.reshape(-1), tail_out]).reshape(orig_shape)


if __name__ == "__main__":
    key = jax.random.PRNGKey(0)
    k1, k2, k3, k4 = jax.random.split(key, 4)

    # 1) Small NCHW feature map: 2*4*16*16 = 2048 elements -> multiple of 128
    #    -> exercises the pad-free fast path.
    x = jax.random.normal(k1, (2, 4, 16, 16), dtype=jnp.float32)
    y = jax.block_until_ready(relu_pallas(x))
    y_ref = jnp.maximum(x, 0.0)
    assert y.shape == x.shape and y.dtype == x.dtype
    assert bool(jnp.allclose(y, y_ref)), "mismatch vs reference ReLU (fast path)"

    # 2) Ragged, tiny (105 elements < 128) -> pure-tail path.
    x2 = jax.random.normal(k2, (3, 5, 7), dtype=jnp.float32)
    y2 = jax.block_until_ready(relu_pallas(x2))
    assert y2.shape == x2.shape and y2.dtype == x2.dtype
    assert bool(jnp.allclose(y2, jnp.maximum(x2, 0.0))), "mismatch (tail-only path)"

    # 3) Ragged with a 128-aligned bulk (3*67 = 201 elements) -> bulk kernel +
    #    tail + concat path.
    x3 = jax.random.normal(k3, (3, 67), dtype=jnp.float32)
    y3 = jax.block_until_ready(relu_pallas(x3))
    assert y3.shape == x3.shape and y3.dtype == x3.dtype
    assert bool(jnp.allclose(y3, jnp.maximum(x3, 0.0))), "mismatch (bulk+tail path)"

    # 4) bf16 fast path -> exercises dtype-aware (byte-sized) tiling.
    x4 = jax.random.normal(k4, (2, 8, 128), dtype=jnp.bfloat16)
    y4 = jax.block_until_ready(relu_pallas(x4))
    assert y4.shape == x4.shape and y4.dtype == x4.dtype
    assert bool(jnp.allclose(y4.astype(jnp.float32),
                             jnp.maximum(x4, jnp.zeros((), jnp.bfloat16)).astype(jnp.float32))), \
        "mismatch (bf16 path)"

    print("KERNEL_OK")
</pallas_src>

<mosaic_0001>
module attributes {stable_mosaic.version = 11 : i64} {
  func.func @_relu_kernel(%arg0: i32, %arg1: memref<16x128xf32, #tpu.memory_space<vmem>>, %arg2: memref<16x128xf32, #tpu.memory_space<vmem>>) attributes {dimension_semantics = [#tpu.dimension_semantics<parallel>], iteration_bounds = array<i64: 1>, scalar_prefetch = 0 : i64, scratch_operands = 0 : i64, tpu.core_type = #tpu.core_type<tc>, window_params = [{transform_indices = @transform_0, window_bounds = array<i64: 16, 128>}, {transform_indices = @transform_1, window_bounds = array<i64: 16, 128>}]} {
    %c0 = arith.constant 0 : index
    %c0_0 = arith.constant 0 : index
    %0 = vector.load %arg1[%c0, %c0_0] : memref<16x128xf32, #tpu.memory_space<vmem>>, vector<16x128xf32>
    %cst = arith.constant 0.000000e+00 : f32
    %1 = vector.broadcast %cst : f32 to vector<16x128xf32>
    %2 = arith.maximumf %0, %1 : vector<16x128xf32>
    %c0_1 = arith.constant 0 : index
    %c0_2 = arith.constant 0 : index
    %3 = vector.load %arg2[%c0_1, %c0_2] : memref<16x128xf32, #tpu.memory_space<vmem>>, vector<16x128xf32>
    tpu.vector_store %arg2[%c0_1, %c0_2], %2 {strides = array<i32>} : memref<16x128xf32, #tpu.memory_space<vmem>>, vector<16x128xf32>,
    return
  }
  func.func @transform_0(%arg0: i32) -> (i32, i32) {
    %c0_i32 = arith.constant 0 : i32
    %c0_i32_0 = arith.constant 0 : i32
    return %arg0, %c0_i32 : i32, i32
  }
  func.func @transform_1(%arg0: i32) -> (i32, i32) {
    %c0_i32 = arith.constant 0 : i32
    %c0_i32_0 = arith.constant 0 : i32
    return %arg0, %c0_i32 : i32, i32
  }
}

</mosaic_0001>

<bundles_post_ra>
// kernel: tpu_custom_call.1
= control target key start
LH: loop header
LB: loop body
LE: loop exit
PB: predicated region body
PF: predicated region fallthrough
CT: control target
= control target key end

     0   :  { %6 = vsyncpa [#allocation3], 0  ;;  %s114_s0 = inlined_call_operand.hbm [shape: f32[16,128], index: 0, kind: input, shape index: {}]   ;;  %s115_s1 = inlined_call_operand.hbm [shape: f32[16,128], index: 1, kind: output, shape index: {}]  }
   0x1   :  { %7 = vsyncpa [#allocation4], 0  ;;  %s94_s6 = smov [#allocation2]  }
   0x2   :  { %s13_s7 = sshll.u32 %s94_s6, 4  ;;  %s14_s7 = int_to_ptr.vmem [resolvable:$true] %s13_s7 }
   0x3   :  { %s58_s8 = scalar_lea.vmem %s14_s7, 256  ;;  %p63_p1 = scmp.lt.s32.totalorder %s14_s7, %s14_s7 }
   0x4   :  { %p59_p0 = scmp.ne.s32.totalorder %s14_s7, %s58_s8  ;;  %p64_p2 = scmp.lt.s32.totalorder %s58_s8, %s58_s8 }
   0x6   :  { %p65_p3 = por %p64_p2, %p63_p1 }
   0x8   :  { %p66_p4 = pnand %p65_p3, %p59_p0 }
   0xa   :  { %69 = shalt.err (!%p66_p4)
}
   0xb   :  { %s95_s9 = smov 128   ;;  %s96_s10 = smov 8  }
   0xc   :  { %19 = dma.hbm_to_vmem [thread:$0]  %s114_s0, 256, %s14_s7, [#allocation3], %s95_s9, %s95_s9, %s96_s10  }
   0xd   :  { %90 = dma.done.wait [#allocation3], 256  }
   0xe   :  { %91 = vsyncadd [#allocation3], 4294967040  ;;  %s97_s13 = smov [#allocation5]   ;;  %v23_v0 = vld [vmem:[#allocation2] sm:$0xff]  ;;  %v24_v1 = vld [vmem:[#allocation2 + $0x8] sm:$0xff] }
   0xf   :  { %s34_s14 = sshll.u32 %s97_s13, 4  ;;  %v25_v2 = vmax.f32 %v23_v0, 0.0  ;;  %v26_v3 = vmax.f32 %v24_v1, 0.0  ;;  %s35_s14 = int_to_ptr.vmem [resolvable:$true] %s34_s14 }
  0x10   :  { %s70_s15 = scalar_lea.vmem %s35_s14, 256  ;;  %p75_p6 = scmp.lt.s32.totalorder %s35_s14, %s35_s14 }
  0x11   :  { %27 = vst [vmem:[#allocation5] sm:$0xff] %v25_v2  ;;  %28 = vst [vmem:[#allocation5 + $0x8] sm:$0xff] %v26_v3  ;;  %p71_p5 = scmp.ne.s32.totalorder %s35_s14, %s70_s15  ;;  %p76_p7 = scmp.lt.s32.totalorder %s70_s15, %s70_s15 }
  0x13   :  { %p77_p8 = por %p76_p7, %p75_p6 }
  0x15   :  { %p78_p9 = pnand %p77_p8, %p71_p5 }
  0x17   :  { %81 = shalt.err (!%p78_p9)
}
  0x18   :  { %40 = dma.vmem_to_hbm [thread:$0]  %s35_s14, 256, %s115_s1, [#allocation4], %s95_s9, %s95_s9, %s96_s10  }
  0x19   :  { %92 = dma.done.wait [#allocation4], 256  }
  0x1a   :  { %93 = vsyncadd [#allocation4], 4294967040 }
  0x1b   :  { %44 = vsyncpa [#allocation3], 1 }
  0x1c   :  { %45 = vsyncpa [#allocation4], 1 }

</bundles_post_ra>
